<compile_context>
chip_gen: v5e
topology: v5e:2x2
jax: 0.10.0
libtpu: 0.0.40
codegen_flags: <defaults>
</compile_context>

<pallas_src>
import functools
import math

import jax
import jax.numpy as jnp
from jax.experimental import pallas as pl
from jax.experimental.pallas import tpu as pltpu


def _round_up(n: int, m: int) -> int:
    return ((n + m - 1) // m) * m


def _nbytes(a) -> int:
    return math.prod(a.shape) * jnp.dtype(a.dtype).itemsize


def _pick_tile_m(batch: int) -> int:
    """Batch tile: sublane-aligned (8), big enough to amortize the per-grid-step
    overhead, 256-aligned at large B (v6e/v7x 2x256 MXU) and capped at 512 so the
    double-buffered x/out tiles stay small in VMEM. Keeps grid_b >= 2 once
    B > 256 so dimension_semantics=('parallel',) can shard across v7x's 2 TCs."""
    bp8 = _round_up(batch, 8)
    if bp8 <= 256:
        return bp8            # single step; too small to be worth splitting
    if bp8 <= 1024:
        return 256            # 256-aligned, grid_b >= 2
    return 512                # very large batches: amortize step overhead


def _fused_mlp_kernel(*refs, num_layers: int, mxu_dtype, precision):
    """refs = (x, w1, b1, w2, b2, ..., wL, bL, out). All blocks VMEM-resident.

    Computes out = Linear_L(...Tanh(Linear_1(x))...). Inter-layer activations
    never leave VMEM/vregs; accumulation is f32; weights are pre-padded (and
    pre-cast if mxu_dtype is set) outside the kernel, so there are no per-step
    weight casts here.
    """
    x_ref = refs[0]
    o_ref = refs[1 + 2 * num_layers]

    h = x_ref[...]
    h = h.astype(mxu_dtype) if mxu_dtype is not None else h.astype(jnp.float32)

    for l in range(num_layers):
        w = refs[1 + 2 * l][...]                       # pre-padded / pre-cast
        b = refs[2 + 2 * l][...].astype(jnp.float32)   # (1, out_pad) broadcasts
        # MXU matmul with f32 accumulation; bias add on VPU, tanh on EUP (f32).
        h = jnp.dot(h, w, preferred_element_type=jnp.float32,
                    precision=precision) + b
        if l < num_layers - 1:
            h = jnp.tanh(h)
            if mxu_dtype is not None:
                h = h.astype(mxu_dtype)                # feed MXU in bf16 next layer
    o_ref[...] = h.astype(o_ref.dtype)


def prepare_mlp_params(params, *, mxu_dtype=None):
    """One-time (outside the jitted per-call path) padding / casting of params.

    params: list of (W (in_l, out_l), b (out_l,)), W stored input-major so that
    y = x @ W + b matches PyTorch's y = x @ W_pt.T + b.

    Output feature dims are padded to multiples of 128 (lane-dense MXU/vst).
    The FIRST layer's input dim is NOT padded (x is read unpadded from HBM);
    subsequent layers' input dims are padded to match the previous layer's
    padded output width (those activations live only in VMEM/vregs).
    Biases stay f32 (added after the f32-accumulating matmul).
    """
    prepared = []
    for l, (w, b) in enumerate(params):
        fi, fo = w.shape
        fop = _round_up(fo, 128)
        fip = fi if l == 0 else _round_up(fi, 128)
        w_p = jnp.pad(w, ((0, fip - fi), (0, fop - fo)))
        if mxu_dtype is not None:
            w_p = w_p.astype(mxu_dtype)
        b_p = jnp.pad(b, (0, fop - fo)).astype(jnp.float32).reshape(1, fop)
        prepared.append((w_p, b_p))
    return prepared


def mlp_forward_fused(x, padded_params, *, out_dim, mxu_dtype=None,
                      out_dtype=None, precision=None):
    """Fused MLP forward. x: (B, In); padded_params from prepare_mlp_params().

    Equivalent to: x -> Linear -> Tanh -> ... -> Linear (no activation on last).
    `out_dim` is the true (unpadded) final feature dim; it must be static under jit.
    """
    B, in_dim = x.shape
    num_layers = len(padded_params)
    assert padded_params[0][0].shape[0] == in_dim, "first weight rows != in_dim"

    out_dtype = x.dtype if out_dtype is None else out_dtype
    out_pad = padded_params[-1][0].shape[1]

    # Batch tiling (only the batch dim is padded in HBM).
    tm = _pick_tile_m(B)
    b_pad = _round_up(B, tm)
    grid_b = b_pad // tm
    x_p = x if b_pad == B else jnp.pad(x, ((0, b_pad - B), (0, 0)))

    flat_inputs = [x_p]
    in_specs = [
        pl.BlockSpec((tm, in_dim), lambda i: (i, 0),
                     memory_space=pltpu.MemorySpace.VMEM)
    ]
    for (w_p, b_p) in padded_params:
        flat_inputs += [w_p, b_p]
        # Constant block index -> weights/biases DMA'd once and stay VMEM-resident.
        in_specs += [
            pl.BlockSpec(w_p.shape, lambda i: (0, 0),
                         memory_space=pltpu.MemorySpace.VMEM),
            pl.BlockSpec(b_p.shape, lambda i: (0, 0),
                         memory_space=pltpu.MemorySpace.VMEM),
        ]
    # TODO(synk): for very large hidden dims (weights ~tens of MiB, esp. v7x's
    # 64 MiB VMEM), single-buffer the resident weights / tile the K,N dims with
    # a VMEM accumulator instead of keeping every layer fully resident.

    # Advisory cost estimate (padded shapes; helps XLA schedule the custom call).
    flops = 2 * b_pad * sum(w.shape[0] * w.shape[1] for w, _ in padded_params)
    transcendentals = b_pad * sum(w.shape[1] for w, _ in padded_params[:-1])
    bytes_accessed = (_nbytes(x_p)
                      + sum(_nbytes(w) + _nbytes(b) for w, b in padded_params)
                      + b_pad * out_pad * jnp.dtype(out_dtype).itemsize)
    cost = pl.CostEstimate(flops=flops, transcendentals=transcendentals,
                           bytes_accessed=bytes_accessed)

    # Raise scoped VMEM only when actually needed (v5e default is ~16 MiB).
    vmem_est = (2 * tm * in_dim * jnp.dtype(x.dtype).itemsize
                + 2 * tm * out_pad * jnp.dtype(out_dtype).itemsize
                + 2 * sum(_nbytes(w) + _nbytes(b) for w, b in padded_params))
    cp_kwargs = dict(dimension_semantics=("parallel",))
    if vmem_est > 16 * 1024 * 1024:
        cp_kwargs["vmem_limit_bytes"] = min(int(vmem_est * 1.5), 100 * 1024 * 1024)

    kernel = functools.partial(_fused_mlp_kernel, num_layers=num_layers,
                               mxu_dtype=mxu_dtype, precision=precision)

    out_p = pl.pallas_call(
        kernel,
        out_shape=jax.ShapeDtypeStruct((b_pad, out_pad), out_dtype),
        grid=(grid_b,),
        in_specs=in_specs,
        out_specs=pl.BlockSpec((tm, out_pad), lambda i: (i, 0),
                               memory_space=pltpu.MemorySpace.VMEM),
        compiler_params=pltpu.CompilerParams(**cp_kwargs),
        cost_estimate=cost,
    )(*flat_inputs)

    # Strip batch / lane padding.
    return out_p[:B, :out_dim]


def init_mlp_params(sizes, key, dtype=jnp.float32):
    """Deterministic init mimicking nn.Linear default (uniform +-1/sqrt(fan_in)).

    Weights stored (in_features, out_features) so y = x @ W + b matches PyTorch's
    y = x @ W_pt.T + b with W_pt of shape (out, in).
    """
    params = []
    for i in range(len(sizes) - 1):
        fan_in, fan_out = sizes[i], sizes[i + 1]
        key, kw, kb = jax.random.split(key, 3)
        bound = 1.0 / math.sqrt(fan_in)
        w = jax.random.uniform(kw, (fan_in, fan_out), dtype, -bound, bound)
        b = jax.random.uniform(kb, (fan_out,), dtype, -bound, bound)
        params.append((w, b))
    return params


if __name__ == "__main__":
    key = jax.random.PRNGKey(0)
    # MLP(sizes): Linear(32,64)+Tanh, Linear(64,48)+Tanh, Linear(48,16)
    sizes = (32, 64, 48, 16)
    batch = 8

    k_x, k_p = jax.random.split(key)
    x = jax.random.normal(k_x, (batch, sizes[0]), jnp.float32)
    params = init_mlp_params(sizes, k_p)

    # One-time padding (outside the jitted per-call path). For v6e/v7x throughput
    # at real sizes, pass mxu_dtype=jnp.bfloat16 here and below.
    padded_params = prepare_mlp_params(params, mxu_dtype=None)

    fwd = jax.jit(mlp_forward_fused,
                  static_argnames=("out_dim", "mxu_dtype", "out_dtype", "precision"))
    out = fwd(x, padded_params, out_dim=sizes[-1])
    jax.block_until_ready(out)

    # Cross-check against plain-JAX reference (f32 end-to-end, like PyTorch fp32).
    ref = x
    for i, (w, b) in enumerate(params):
        ref = ref @ w + b
        if i < len(params) - 1:
            ref = jnp.tanh(ref)
    assert out.shape == (batch, sizes[-1])
    assert jnp.allclose(out, ref, atol=1e-5, rtol=1e-5), float(
        jnp.max(jnp.abs(out - ref)))

    print("KERNEL_OK")
</pallas_src>

<mosaic_0001>
module attributes {stable_mosaic.version = 11 : i64} {
  func.func @_fused_mlp_kernel(%arg0: i32, %arg1: memref<8x32xf32, #tpu.memory_space<vmem>>, %arg2: memref<32x128xf32, #tpu.memory_space<vmem>>, %arg3: memref<1x128xf32, #tpu.memory_space<vmem>>, %arg4: memref<128x128xf32, #tpu.memory_space<vmem>>, %arg5: memref<1x128xf32, #tpu.memory_space<vmem>>, %arg6: memref<128x128xf32, #tpu.memory_space<vmem>>, %arg7: memref<1x128xf32, #tpu.memory_space<vmem>>, %arg8: memref<8x128xf32, #tpu.memory_space<vmem>>) attributes {dimension_semantics = [#tpu.dimension_semantics<parallel>], iteration_bounds = array<i64: 1>, scalar_prefetch = 0 : i64, scratch_operands = 0 : i64, tpu.core_type = #tpu.core_type<tc>, window_params = [{transform_indices = @transform_0, window_bounds = array<i64: 8, 32>}, {pipeline_mode = #tpu.pipeline_mode<synchronous>, transform_indices = @transform_1, window_bounds = array<i64: 32, 128>}, {pipeline_mode = #tpu.pipeline_mode<synchronous>, transform_indices = @transform_2, window_bounds = array<i64: 1, 128>}, {pipeline_mode = #tpu.pipeline_mode<synchronous>, transform_indices = @transform_3, window_bounds = array<i64: 128, 128>}, {pipeline_mode = #tpu.pipeline_mode<synchronous>, transform_indices = @transform_4, window_bounds = array<i64: 1, 128>}, {pipeline_mode = #tpu.pipeline_mode<synchronous>, transform_indices = @transform_5, window_bounds = array<i64: 128, 128>}, {pipeline_mode = #tpu.pipeline_mode<synchronous>, transform_indices = @transform_6, window_bounds = array<i64: 1, 128>}, {transform_indices = @transform_7, window_bounds = array<i64: 8, 128>}]} {
    %c0 = arith.constant 0 : index
    %c0_0 = arith.constant 0 : index
    %0 = vector.load %arg1[%c0, %c0_0] : memref<8x32xf32, #tpu.memory_space<vmem>>, vector<8x32xf32>
    %c0_1 = arith.constant 0 : index
    %c0_2 = arith.constant 0 : index
    %1 = vector.load %arg2[%c0_1, %c0_2] : memref<32x128xf32, #tpu.memory_space<vmem>>, vector<32x128xf32>
    %c0_3 = arith.constant 0 : index
    %c0_4 = arith.constant 0 : index
    %2 = vector.load %arg3[%c0_3, %c0_4] : memref<1x128xf32, #tpu.memory_space<vmem>>, vector<1x128xf32>
    %cst = arith.constant dense<0.000000e+00> : vector<8x128xf32>
    %3 = tpu.matmul %0, %1, %cst {dimension_numbers = #tpu.dot_dimension_numbers<[1], [0], [0], [1], [0, 0, 1, 1], [], []>} : vector<8x32xf32>, vector<32x128xf32>, vector<8x128xf32> -> vector<8x128xf32>
    %4 = vector.broadcast %2 : vector<1x128xf32> to vector<8x128xf32>
    %5 = arith.addf %3, %4 : vector<8x128xf32>
    %6 = math.tanh %5 : vector<8x128xf32>
    %c0_5 = arith.constant 0 : index
    %c0_6 = arith.constant 0 : index
    %7 = vector.load %arg4[%c0_5, %c0_6] : memref<128x128xf32, #tpu.memory_space<vmem>>, vector<128x128xf32>
    %c0_7 = arith.constant 0 : index
    %c0_8 = arith.constant 0 : index
    %8 = vector.load %arg5[%c0_7, %c0_8] : memref<1x128xf32, #tpu.memory_space<vmem>>, vector<1x128xf32>
    %cst_9 = arith.constant dense<0.000000e+00> : vector<8x128xf32>
    %9 = tpu.matmul %6, %7, %cst_9 {dimension_numbers = #tpu.dot_dimension_numbers<[1], [0], [0], [1], [0, 0, 1, 1], [], []>} : vector<8x128xf32>, vector<128x128xf32>, vector<8x128xf32> -> vector<8x128xf32>
    %10 = vector.broadcast %8 : vector<1x128xf32> to vector<8x128xf32>
    %11 = arith.addf %9, %10 : vector<8x128xf32>
    %12 = math.tanh %11 : vector<8x128xf32>
    %c0_10 = arith.constant 0 : index
    %c0_11 = arith.constant 0 : index
    %13 = vector.load %arg6[%c0_10, %c0_11] : memref<128x128xf32, #tpu.memory_space<vmem>>, vector<128x128xf32>
    %c0_12 = arith.constant 0 : index
    %c0_13 = arith.constant 0 : index
    %14 = vector.load %arg7[%c0_12, %c0_13] : memref<1x128xf32, #tpu.memory_space<vmem>>, vector<1x128xf32>
    %cst_14 = arith.constant dense<0.000000e+00> : vector<8x128xf32>
    %15 = tpu.matmul %12, %13, %cst_14 {dimension_numbers = #tpu.dot_dimension_numbers<[1], [0], [0], [1], [0, 0, 1, 1], [], []>} : vector<8x128xf32>, vector<128x128xf32>, vector<8x128xf32> -> vector<8x128xf32>
    %16 = vector.broadcast %14 : vector<1x128xf32> to vector<8x128xf32>
    %17 = arith.addf %15, %16 : vector<8x128xf32>
    %c0_15 = arith.constant 0 : index
    %c0_16 = arith.constant 0 : index
    %18 = vector.load %arg8[%c0_15, %c0_16] : memref<8x128xf32, #tpu.memory_space<vmem>>, vector<8x128xf32>
    tpu.vector_store %arg8[%c0_15, %c0_16], %17 {strides = array<i32>} : memref<8x128xf32, #tpu.memory_space<vmem>>, vector<8x128xf32>,
    return
  }
  func.func @transform_0(%arg0: i32) -> (i32, i32) {
    %c0_i32 = arith.constant 0 : i32
    %c0_i32_0 = arith.constant 0 : i32
    return %arg0, %c0_i32 : i32, i32
  }
  func.func @transform_1(%arg0: i32) -> (i32, i32) {
    %c0_i32 = arith.constant 0 : i32
    %c0_i32_0 = arith.constant 0 : i32
    %c0_i32_1 = arith.constant 0 : i32
    return %c0_i32, %c0_i32_0 : i32, i32
  }
  func.func @transform_2(%arg0: i32) -> (i32, i32) {
    %c0_i32 = arith.constant 0 : i32
    %c0_i32_0 = arith.constant 0 : i32
    %c0_i32_1 = arith.constant 0 : i32
    return %c0_i32, %c0_i32_0 : i32, i32
  }
  func.func @transform_3(%arg0: i32) -> (i32, i32) {
    %c0_i32 = arith.constant 0 : i32
    %c0_i32_0 = arith.constant 0 : i32
    %c0_i32_1 = arith.constant 0 : i32
    return %c0_i32, %c0_i32_0 : i32, i32
  }
  func.func @transform_4(%arg0: i32) -> (i32, i32) {
    %c0_i32 = arith.constant 0 : i32
    %c0_i32_0 = arith.constant 0 : i32
    %c0_i32_1 = arith.constant 0 : i32
    return %c0_i32, %c0_i32_0 : i32, i32
  }
  func.func @transform_5(%arg0: i32) -> (i32, i32) {
    %c0_i32 = arith.constant 0 : i32
    %c0_i32_0 = arith.constant 0 : i32
    %c0_i32_1 = arith.constant 0 : i32
    return %c0_i32, %c0_i32_0 : i32, i32
  }
  func.func @transform_6(%arg0: i32) -> (i32, i32) {
    %c0_i32 = arith.constant 0 : i32
    %c0_i32_0 = arith.constant 0 : i32
    %c0_i32_1 = arith.constant 0 : i32
    return %c0_i32, %c0_i32_0 : i32, i32
  }
  func.func @transform_7(%arg0: i32) -> (i32, i32) {
    %c0_i32 = arith.constant 0 : i32
    %c0_i32_0 = arith.constant 0 : i32
    return %arg0, %c0_i32 : i32, i32
  }
}

</mosaic_0001>

<bundles_post_ra>
// kernel: mlp_forward_fused.1
= control target key start
LH: loop header
LB: loop body
LE: loop exit
PB: predicated region body
PF: predicated region fallthrough
CT: control target
= control target key end

     0   :  { %12 = vsyncpa [#allocation3], 0  ;;  %s437_s0 = inlined_call_operand.hbm [shape: f32[8,32], index: 0, kind: input, shape index: {}]   ;;  %s438_s1 = inlined_call_operand.hbm [shape: f32[32,128], index: 1, kind: input, shape index: {}]   ;;  %s439_s2 = inlined_call_operand.vmem [shape: f32[1,128], index: 2, kind: input, shape index: {}]   ;;  %s440_s3 = inlined_call_operand.hbm [shape: f32[128,128], index: 3, kind: input, shape index: {}]   ;;  %s441_s4 = inlined_call_operand.vmem [shape: f32[1,128], index: 4, kind: input, shape index: {}]   ;;  %s442_s5 = inlined_call_operand.hbm [shape: f32[128,128], index: 5, kind: input, shape index: {}]   ;;  %s443_s6 = inlined_call_operand.vmem [shape: f32[1,128], index: 6, kind: input, shape index: {}]   ;;  %s444_s7 = inlined_call_operand.hbm [shape: f32[8,128], index: 7, kind: output, shape index: {}]  }
   0x1   :  { %13 = vsyncpa [#allocation6], 0 }
   0x2   :  { %14 = vsyncpa [#allocation9], 0  ;;  %s31_s26 = sshll.u32 %s438_s1, 4  ;;  %s32_s26 = int_to_ptr.hbm [resolvable:$true] %s31_s26 }
   0x3   :  { %15 = vsyncpa [#allocation4], 0  ;;  %s366_s27 = smov [#allocation5]   ;;  %s21_s8 = sshll.u32 %s437_s0, 4  ;;  %s22_s8 = int_to_ptr.hbm [resolvable:$true] %s21_s8 }
   0x4   :  { %s33_s28 = sshll.u32 %s366_s27, 4  ;;  %s367_s9 = smov 128   ;;  %s34_s28 = int_to_ptr.vmem [resolvable:$true] %s33_s28 }
   0x5   :  { %s368_s10 = smov 8   ;;  %s369_s11 = smov [#allocation2]  }
   0x6   :  { %39 = dma.hbm_to_vmem [thread:$0]  %s32_s26, 512, %s34_s28, [#allocation6], %s367_s9, %s367_s9, %s368_s10  }
   0x7   :  { %s23_s12 = sshll.u32 %s369_s11, 4  ;;  %s46_s15 = sshll.u32 %s440_s3, 4  ;;  %s24_s12 = int_to_ptr.vmem [resolvable:$true] %s23_s12  ;;  %s47_s15 = int_to_ptr.hbm [resolvable:$true] %s46_s15 }
   0x8   :  { %26 = dma.hbm_to_vmem [thread:$0]  %s22_s8, 128, %s24_s12, [#allocation3]  }
   0x9   :  { %s61_s17 = sshll.u32 %s442_s5, 4  ;;  %s370_s18 = smov [#allocation7]   ;;  %s62_s17 = int_to_ptr.hbm [resolvable:$true] %s61_s17 }
   0xa   :  { %s48_s19 = sshll.u32 %s370_s18, 4  ;;  %s371_s0 = smov [#allocation8]   ;;  %s49_s19 = int_to_ptr.vmem [resolvable:$true] %s48_s19 }
   0xb   :  { %54 = dma.hbm_to_vmem [thread:$0]  %s47_s15, 2048, %s49_s19, [#allocation6], %s367_s9, %s367_s9, %s368_s10  }
   0xc   :  { %s63_s20 = sshll.u32 %s371_s0, 4  ;;  %s64_s20 = int_to_ptr.vmem [resolvable:$true] %s63_s20 }
   0xd   :  { %69 = dma.hbm_to_vmem [thread:$0]  %s62_s17, 2048, %s64_s20, [#allocation9], %s367_s9, %s367_s9, %s368_s10  }
   0xe   :  { %358 = dma.done.wait [#allocation3], 128  }
   0xf   :  { %359 = vsyncadd [#allocation3], 4294967168 }
  0x10   :  { %360 = dma.done.wait [#allocation6], 2560  }
  0x11   :  { %361 = vsyncadd [#allocation6], 4294964736 }
  0x12   :  { %362 = dma.done.wait [#allocation9], 2048  }
  0x13   :  { %363 = vsyncadd [#allocation9], 4294965248  ;;  %v92_v0 = vld [vmem:[#allocation5 + $0x18] sm:$0xff]  ;;  %v91_v1 = vld [vmem:[#allocation5 + $0x10] sm:$0xff]  ;;  %vm97_vm0 = vcmask 261120   ;;  %s372_s24 = smov [#allocation10]  }
  0x14   :  { %113 = vmatpush.msra.mxu0 %v92_v0  ;;  %v137_v2 = vld [vmem:[#allocation7 + $0x78] sm:$0xff]  ;;  %v90_v3 = vld [vmem:[#allocation5 + $0x8] sm:$0xff]  ;;  %v136_v4 = vld [vmem:[#allocation7 + $0x70] sm:$0xff]  ;;  %s209_s25 = sshll.u32 %s372_s24, 4  ;;  %s211_s28 = sshll.u32 %s444_s7, 4  ;;  %s210_s25 = int_to_ptr.vmem [resolvable:$true] %s209_s25  ;;  %s212_s28 = int_to_ptr.hbm [resolvable:$true] %s211_s28 }
  0x15   :  { %142 = vmatpush.msra.mxu1 %v137_v2  ;;  %v135_v5 = vld [vmem:[#allocation7 + $0x68] sm:$0xff]  ;;  %v89_v6 = vld [vmem:[#allocation5] sm:$0xff]  ;;  %v88_v7 = vld [vmem:[#allocation2] sm:$0xff] }
  0x16   :  { %114 = vmatpush.msra.mxu0 %v91_v1  ;;  %v134_v8 = vld [vmem:[#allocation7 + $0x60] sm:$0xff]  ;;  %v133_v9 = vld [vmem:[#allocation7 + $0x58] sm:$0xff]  ;;  %v132_v10 = vld [vmem:[#allocation7 + $0x50] sm:$0xff] }
  0x17   :  { %143 = vmatpush.msra.mxu1 %v136_v4  ;;  %v131_v11 = vld [vmem:[#allocation7 + $0x48] sm:$0xff]  ;;  %v130_v12 = vld [vmem:[#allocation7 + $0x40] sm:$0xff]  ;;  %v129_v13 = vld [vmem:[#allocation7 + $0x38] sm:$0xff] }
  0x18   :  { %115 = vmatpush.msra.mxu0 %v90_v3  ;;  %v128_v14 = vld [vmem:[#allocation7 + $0x30] sm:$0xff]  ;;  %v127_v15 = vld [vmem:[#allocation7 + $0x28] sm:$0xff]  ;;  %v126_v16 = vld [vmem:[#allocation7 + $0x20] sm:$0xff] }
  0x19   :  { %144 = vmatpush.msra.mxu1 %v135_v5  ;;  %v125_v17 = vld [vmem:[#allocation7 + $0x18] sm:$0xff]  ;;  %v124_v18 = vld [vmem:[#allocation7 + $0x10] sm:$0xff]  ;;  %v123_v19 = vld [vmem:[#allocation7 + $0x8] sm:$0xff] }
  0x1a   :  { %116 = vmatpush.msra.mxu0 %v89_v6  ;;  %v122_v20 = vld [vmem:[#allocation7] sm:$0xff]  ;;  %v178_v21 = vld [vmem:[#allocation8 + $0x78] sm:$0xff]  ;;  %v177_v22 = vld [vmem:[#allocation8 + $0x70] sm:$0xff] }
  0x1b   :  { %223 = vmatmul.msk.f32.vlgmr.msra.gmra.mxu0 %vm97_vm0, %v88_v7  ;;  %145 = vmatpush.msra.mxu1 %v134_v8  ;;  %v176_v23 = vld [vmem:[#allocation8 + $0x68] sm:$0xff]  ;;  %v175_v24 = vld [vmem:[#allocation8 + $0x60] sm:$0xff]  ;;  %v174_v25 = vld [vmem:[#allocation8 + $0x58] sm:$0xff] }
  0x1c   :  { %183 = vmatpush.msra.mxu2 %v178_v21  ;;  %v173_v26 = vld [vmem:[#allocation8 + $0x50] sm:$0xff]  ;;  %v172_v27 = vld [vmem:[#allocation8 + $0x48] sm:$0xff]  ;;  %v171_v28 = vld [vmem:[#allocation8 + $0x40] sm:$0xff] }
  0x1d   :  { %146 = vmatpush.msra.mxu1 %v133_v9  ;;  %v170_v29 = vld [vmem:[#allocation8 + $0x38] sm:$0xff]  ;;  %v169_v30 = vld [vmem:[#allocation8 + $0x30] sm:$0xff]  ;;  %v168_v31 = vld [vmem:[#allocation8 + $0x28] sm:$0xff] }
  0x1e   :  { %184 = vmatpush.msra.mxu2 %v177_v22  ;;  %v231_v32 = vld [vmem:[%s439_s2] ss:$0 sm:$0xff]  ;;  %v167_v36 = vld [vmem:[#allocation8 + $0x20] sm:$0xff]  ;;  %v165_v38 = vld [vmem:[#allocation8 + $0x10] sm:$0xff] }
  0x1f   :  { %147 = vmatpush.msra.mxu1 %v132_v10  ;;  %v166_v37 = vld [vmem:[#allocation8 + $0x18] sm:$0xff]  ;;  %v164_v39 = vld [vmem:[#allocation8 + $0x8] sm:$0xff]  ;;  %v163_v40 = vld [vmem:[#allocation8] sm:$0xff] }
  0x20   :  { %185 = vmatpush.msra.mxu2 %v176_v23  ;;  %v232_v41 = vld [vmem:[%s441_s4] ss:$0 sm:$0xff] }
  0x21   :  { %148 = vmatpush.msra.mxu1 %v131_v11  ;;  %v233_v45 = vld [vmem:[%s443_s6] ss:$0 sm:$0xff] }
  0x22   :  { %186 = vmatpush.msra.mxu2 %v175_v24 }
  0x23   :  { %149 = vmatpush.msra.mxu1 %v130_v12 }
  0x24   :  { %187 = vmatpush.msra.mxu2 %v174_v25 }
  0x25   :  { %150 = vmatpush.msra.mxu1 %v129_v13 }
  0x26   :  { %188 = vmatpush.msra.mxu2 %v173_v26 }
  0x27   :  { %151 = vmatpush.msra.mxu1 %v128_v14 }
  0x28   :  { %189 = vmatpush.msra.mxu2 %v172_v27 }
  0x29   :  { %152 = vmatpush.msra.mxu1 %v127_v15 }
  0x2a   :  { %190 = vmatpush.msra.mxu2 %v171_v28 }
  0x2b   :  { %153 = vmatpush.msra.mxu1 %v126_v16 }
  0x2c   :  { %191 = vmatpush.msra.mxu2 %v170_v29 }
  0x2d   :  { %154 = vmatpush.msra.mxu1 %v125_v17 }
  0x2e   :  { %192 = vmatpush.msra.mxu2 %v169_v30 }
  0x2f   :  { %155 = vmatpush.msra.mxu1 %v124_v18 }
  0x30   :  { %193 = vmatpush.msra.mxu2 %v168_v31 }
  0x31   :  { %156 = vmatpush.msra.mxu1 %v123_v19 }
  0x32   :  { %194 = vmatpush.msra.mxu2 %v167_v36 }
  0x33   :  { %157 = vmatpush.msra.mxu1 %v122_v20 }
  0x34   :  { %195 = vmatpush.msra.mxu2 %v166_v37 }
  0x36   :  { %196 = vmatpush.msra.mxu2 %v165_v38 }
  0x38   :  { %197 = vmatpush.msra.mxu2 %v164_v39 }
  0x3a   :  { %198 = vmatpush.msra.mxu2 %v163_v40 }
  0x98   :  { %v118_v33 = vpop.f32.mrf.mxu0 }
  0x99   :  { %v119_v34 = vadd.f32 %v231_v32, %v118_v33 }
  0x9b   :  { %234 = vtanh.f32 %v119_v34 }
  0xa1   :  { %v235_v35 = vpop.eup %234 }
  0xa2   :  { %158 = vmatmul.f32.vlgmr.msra.gmra.mxu1 %v235_v35 }
 0x11f   :  { %v159_v42 = vpop.f32.mrf.mxu1 }
 0x120   :  { %v160_v43 = vadd.f32 %v232_v41, %v159_v42 }
 0x122   :  { %236 = vtanh.f32 %v160_v43 }
 0x128   :  { %v237_v44 = vpop.eup %236 }
 0x129   :  { %199 = vmatmul.f32.vlgmr.msra.gmra.mxu2 %v237_v44 }
 0x1ac   :  { %v200_v46 = vpop.f32.mrf.mxu2 }
 0x1ad   :  { %v201_v47 = vadd.f32 %v233_v45, %v200_v46 }
 0x1af   :  { %203 = vst [vmem:[#allocation10] sm:$0xff] %v201_v47 }
 0x1b0   :  { %214 = dma.vmem_to_hbm [thread:$0]  %s210_s25, 128, %s212_s28, [#allocation4]  }
 0x1b1   :  { %364 = dma.done.wait [#allocation4], 128  }
 0x1b2   :  { %365 = vsyncadd [#allocation4], 4294967168 }
 0x1b3   :  { %219 = vsyncpa [#allocation3], 1 }
 0x1b4   :  { %220 = vsyncpa [#allocation6], 1 }
 0x1b5   :  { %221 = vsyncpa [#allocation9], 1 }
 0x1b6   :  { %222 = vsyncpa [#allocation4], 1 }

</bundles_post_ra>
